<compile_context>
chip_gen: v7x
topology: tpu7x:2x2x1
jax: 0.10.0
libtpu: 0.0.40
codegen_flags: <defaults>
</compile_context>

<pallas_src>
import functools

import jax
import jax.numpy as jnp
from jax.experimental import pallas as pl
from jax.experimental.pallas import tpu as pltpu

_LEVELS = (0.4, 0.3, 0.2, 0.1, 0.05)
_GRAY_WEIGHTS = (0.2989, 0.587, 0.114)


def _round_up(x: int, m: int) -> int:
    return ((x + m - 1) // m) * m


def _channel_weights(c: int, n_pixels: int) -> jax.Array:
    """(C, 1) weights such that sum(w * flat_img) == grayscale mean of img."""
    if c == 3:
        wv = jnp.array(_GRAY_WEIGHTS, jnp.float32)
    else:
        # TODO(synk): torchvision only defines adjust_contrast for 1 or 3 channels;
        # for other channel counts a plain mean is used here.
        wv = jnp.full((c,), 1.0 / c, jnp.float32)
    return (wv / float(n_pixels)).reshape(c, 1)


def _vmem_capacity_bytes() -> int:
    """Per-core VMEM capacity (falls back to the smallest modern value, 64 MiB)."""
    try:
        cap = int(getattr(pltpu.get_tpu_info(), "vmem_capacity_bytes", 0))
        if cap > 0:
            return cap
    except Exception:
        pass
    return 64 * 1024 * 1024


# ----------------------------- kernels -----------------------------

def _contrast_fused_kernel(level_ref, w_ref, img_ref, out_ref):
    """Whole (C, N) image resident in VMEM: mean + blend + clamp in one pass."""
    x = img_ref[...].astype(jnp.float32)              # (C, N), upcast on VPU
    per_ch = jnp.sum(x, axis=1, keepdims=True)        # (C, 1): reduce before weighting
    mean = jnp.sum(per_ch * w_ref[...])               # scalar grayscale mean
    level = level_ref[0]                              # SMEM scalar
    out_ref[...] = jnp.clip(level * x + (1.0 - level) * mean,
                            0.0, 1.0).astype(out_ref.dtype)


def _gray_sum_kernel(w_ref, img_ref, sum_ref, *, n, tile, half, needs_mask):
    """Accumulate the weighted (grayscale) sum across lane tiles.

    Grid is (split, half): axis 0 is 'parallel' (one accumulator block per core on
    v7x), axis 1 is the 'arbitrary' reduction over lane tiles.
    """
    p = pl.program_id(0)
    j = pl.program_id(1)

    @pl.when(j == 0)
    def _():
        sum_ref[...] = jnp.zeros_like(sum_ref)

    x = img_ref[...].astype(jnp.float32)              # (C, tile)
    if needs_mask:
        # Last (ragged) tile: lanes past the true image end hold garbage — mask them.
        lane = jax.lax.broadcasted_iota(jnp.int32, x.shape, 1)
        valid = n - (p * half + j) * tile
        x = jnp.where(lane < valid, x, 0.0)
    per_ch = jnp.sum(x, axis=1, keepdims=True)        # (C, 1)
    # Broadcast the scalar partial sum over the (8, 128) accumulator block.
    sum_ref[...] += jnp.sum(per_ch * w_ref[...])


def _blend_kernel(level_ref, gsum_ref, img_ref, out_ref, *, split):
    """out = clamp(level*img + (1-level)*mean, 0, 1) — pure VPU elementwise."""
    level = level_ref[0]
    mean = gsum_ref[0, 0]
    if split == 2:
        mean = mean + gsum_ref[8, 0]
    x = img_ref[...].astype(jnp.float32)
    out_ref[...] = jnp.clip(level * x + (1.0 - level) * mean,
                            0.0, 1.0).astype(out_ref.dtype)


# ----------------------------- wrapper -----------------------------

def contrast(img: jax.Array, severity: int, *,
             fused_max_bytes: int | None = None,
             tile_lanes: int | None = None) -> jax.Array:
    """Pallas-accelerated Contrast corruption.

    Args:
      img:       (C, H, W) floating-point image in [0, 1].
      severity:  int in [0, 5]; 0 is identity.
      fused_max_bytes: images up to this many f32-equivalent bytes use the
        single-block fused kernel (default: VMEM capacity // 6).
      tile_lanes: lane tile width for the tiled path (default: ~3 MiB f32 blocks).
    """
    if not isinstance(severity, int):
        raise TypeError("Severity must be an integer.")
    if not 0 <= severity <= 5:
        raise ValueError("Severity must be between 0 and 5.")
    if severity == 0:
        return img
    if img.ndim != 3:
        raise ValueError("Expected an un-batched (C, H, W) image.")
    if not jnp.issubdtype(img.dtype, jnp.floating):
        # TODO(synk): torchvision adjust_contrast on integer images works in the
        # 0..255 domain; only float images in [0, 1] are supported here.
        raise TypeError("contrast expects a floating-point image in [0, 1].")

    level = _LEVELS[severity - 1]
    c, h, w_dim = img.shape
    n = h * w_dim
    flat = img.reshape(c, n)                           # native dtype, lane-dense, no copy
    wgt = _channel_weights(c, n)                       # (C, 1), already divided by n
    level_arr = jnp.array([level], jnp.float32)

    itemsize = jnp.dtype(img.dtype).itemsize
    f32_bytes = c * n * 4
    cap = _vmem_capacity_bytes()
    if fused_max_bytes is None:
        # in-window + out-window + in-kernel f32 temporaries must fit under the limit.
        fused_max_bytes = cap // 6
    fused_vmem_limit = int(cap * 0.85)
    tiled_vmem_limit = min(int(cap * 0.75), 64 * 1024 * 1024)

    if f32_bytes <= fused_max_bytes:
        # ---- single-block fused path: 1 HBM read + 1 write ----
        out_flat = pl.pallas_call(
            _contrast_fused_kernel,
            out_shape=jax.ShapeDtypeStruct((c, n), img.dtype),
            in_specs=[
                pl.BlockSpec(memory_space=pltpu.MemorySpace.SMEM),   # level
                pl.BlockSpec(memory_space=pltpu.MemorySpace.VMEM),   # weights (C,1)
                pl.BlockSpec(memory_space=pltpu.MemorySpace.VMEM),   # image slab
            ],
            out_specs=pl.BlockSpec(memory_space=pltpu.MemorySpace.VMEM),
            compiler_params=pltpu.CompilerParams(
                vmem_limit_bytes=fused_vmem_limit),
            cost_estimate=pl.CostEstimate(
                flops=5 * c * n, transcendentals=0,
                bytes_accessed=2 * c * n * itemsize),
        )(level_arr, wgt, flat)
    else:
        # ---- tiled two-pass path (large images): 2 HBM reads + 1 write ----
        if tile_lanes is None:
            tile_lanes = max(128, (3 * 1024 * 1024) // (c * 4))     # ~3 MiB f32 blocks
        tile = _round_up(min(int(tile_lanes), _round_up(n, 128)), 128)
        num_tiles = pl.cdiv(n, tile)

        # Prefer an even tile count so both v7x TensorCores get an exact half of pass 1.
        if num_tiles % 2 != 0 and num_tiles > 1:
            alt = _round_up(pl.cdiv(n, num_tiles + 1), 128)
            if alt >= 128 and pl.cdiv(n, alt) % 2 == 0:
                tile = alt
                num_tiles = pl.cdiv(n, tile)
        if num_tiles % 2 == 0:
            split, half = 2, num_tiles // 2
        else:
            split, half = 1, num_tiles
        needs_mask = (n % tile) != 0

        # Pass 1: grayscale mean (weighted sum), one (8,128) accumulator block per core.
        gsum = pl.pallas_call(
            functools.partial(_gray_sum_kernel, n=n, tile=tile, half=half,
                              needs_mask=needs_mask),
            out_shape=jax.ShapeDtypeStruct((split * 8, 128), jnp.float32),
            grid=(split, half),
            in_specs=[
                pl.BlockSpec((c, 1), lambda p, j: (0, 0)),
                pl.BlockSpec((c, tile), lambda p, j: (0, p * half + j)),
            ],
            out_specs=pl.BlockSpec((8, 128), lambda p, j: (p, 0)),
            compiler_params=pltpu.CompilerParams(
                dimension_semantics=("parallel", "arbitrary"),
                vmem_limit_bytes=tiled_vmem_limit),
            cost_estimate=pl.CostEstimate(
                flops=2 * c * n, transcendentals=0,
                bytes_accessed=c * n * itemsize),
        )(wgt, flat)

        # Pass 2: elementwise blend + clamp over lane-dense tiles (parallel across cores).
        out_flat = pl.pallas_call(
            functools.partial(_blend_kernel, split=split),
            out_shape=jax.ShapeDtypeStruct((c, n), img.dtype),
            grid=(num_tiles,),
            in_specs=[
                pl.BlockSpec(memory_space=pltpu.MemorySpace.SMEM),   # level
                pl.BlockSpec(memory_space=pltpu.MemorySpace.SMEM),   # pass-1 partials
                pl.BlockSpec((c, tile), lambda i: (0, i)),
            ],
            out_specs=pl.BlockSpec((c, tile), lambda i: (0, i)),
            compiler_params=pltpu.CompilerParams(
                dimension_semantics=("parallel",),
                vmem_limit_bytes=tiled_vmem_limit),
            cost_estimate=pl.CostEstimate(
                flops=3 * c * n, transcendentals=0,
                bytes_accessed=2 * c * n * itemsize),
        )(level_arr, gsum, flat)

    return out_flat.reshape(c, h, w_dim)


# ----------------------------- reference -----------------------------

def contrast_reference(img: jax.Array, severity: int) -> jax.Array:
    """Plain-JAX reference of torchvision adjust_contrast with the module's levels."""
    if severity == 0:
        return img
    level = _LEVELS[severity - 1]
    x = img.astype(jnp.float32)
    c = img.shape[0]
    if c == 3:
        wv = jnp.array(_GRAY_WEIGHTS, jnp.float32).reshape(3, 1, 1)
        mean = jnp.sum(x * wv) / (img.shape[1] * img.shape[2])
    else:
        mean = jnp.mean(x)
    return jnp.clip(level * x + (1.0 - level) * mean, 0.0, 1.0)


if __name__ == "__main__":
    key = jax.random.PRNGKey(0)
    k1, k2, k3, k4, k5 = jax.random.split(key, 5)

    severity = 3  # level = 0.2

    # 1) Small RGB image, lane-aligned -> fused single-block path (f32).
    img1 = jax.random.uniform(k1, (3, 16, 128), dtype=jnp.float32)
    out1 = jax.block_until_ready(contrast(img1, severity))
    ref1 = contrast_reference(img1, severity)
    assert out1.shape == img1.shape and out1.dtype == img1.dtype
    assert float(jnp.max(jnp.abs(out1 - ref1))) < 1e-5

    # 2) Force the tiled path: even tile split (split=2), ragged masked last tile.
    img2 = jax.random.uniform(k2, (3, 24, 96), dtype=jnp.float32)   # n = 2304
    out2 = jax.block_until_ready(
        contrast(img2, severity, fused_max_bytes=0, tile_lanes=1024))
    ref2 = contrast_reference(img2, severity)
    assert out2.shape == img2.shape
    assert float(jnp.max(jnp.abs(out2 - ref2))) < 1e-5

    # 3) Single-channel image with non-128-multiple width -> fused path, no padding.
    img3 = jax.random.uniform(k3, (1, 16, 100), dtype=jnp.float32)
    out3 = jax.block_until_ready(contrast(img3, severity))
    ref3 = contrast_reference(img3, severity)
    assert out3.shape == img3.shape
    assert float(jnp.max(jnp.abs(out3 - ref3))) < 1e-5

    # 4) bf16 image -> native-dtype I/O, f32 compute inside the kernel (fused path).
    img4 = jax.random.uniform(k4, (3, 16, 128), dtype=jnp.float32).astype(jnp.bfloat16)
    out4 = jax.block_until_ready(contrast(img4, severity))
    ref4 = contrast_reference(img4, severity)
    assert out4.dtype == jnp.bfloat16
    assert float(jnp.max(jnp.abs(out4.astype(jnp.float32) - ref4))) < 1e-2

    # 5) bf16 tiled path, exact tiles (no mask), split=2.
    out5 = jax.block_until_ready(
        contrast(img4, severity, fused_max_bytes=0, tile_lanes=512))
    assert float(jnp.max(jnp.abs(out5.astype(jnp.float32) - ref4))) < 1e-2

    # 6) Tiled path where an even split is impossible (split=1), c=1, ragged tail.
    img6 = jax.random.uniform(k5, (1, 15, 20), dtype=jnp.float32)   # n = 300
    out6 = jax.block_until_ready(
        contrast(img6, severity, fused_max_bytes=0, tile_lanes=128))
    ref6 = contrast_reference(img6, severity)
    assert float(jnp.max(jnp.abs(out6 - ref6))) < 1e-5

    # 7) severity == 0 is identity.
    assert bool(jnp.array_equal(contrast(img1, 0), img1))

    print("KERNEL_OK")
</pallas_src>

<mosaic_0001>
module attributes {stable_mosaic.version = 11 : i64} {
  func.func @_contrast_fused_kernel(%arg0: memref<1xf32, #tpu.memory_space<smem>>, %arg1: memref<3x1xf32, #tpu.memory_space<vmem>>, %arg2: memref<3x2048xf32, #tpu.memory_space<vmem>>, %arg3: memref<3x2048xf32, #tpu.memory_space<vmem>>) attributes {dimension_semantics = [], scalar_prefetch = 0 : i64, scratch_operands = 0 : i64, tpu.core_type = #tpu.core_type<tc>} {
    %c0 = arith.constant 0 : index
    %c0_0 = arith.constant 0 : index
    %0 = vector.load %arg2[%c0, %c0_0] : memref<3x2048xf32, #tpu.memory_space<vmem>>, vector<3x2048xf32>
    %cst = arith.constant dense<0.000000e+00> : vector<3xf32>
    %1 = vector.multi_reduction <add>, %0, %cst [1] : vector<3x2048xf32> to vector<3xf32>
    %2 = vector.shape_cast %1 : vector<3xf32> to vector<3x1xf32>
    %c0_1 = arith.constant 0 : index
    %c0_2 = arith.constant 0 : index
    %3 = vector.load %arg1[%c0_1, %c0_2] : memref<3x1xf32, #tpu.memory_space<vmem>>, vector<3x1xf32>
    %4 = arith.mulf %2, %3 : vector<3x1xf32>
    %5 = vector.shape_cast %4 : vector<3x1xf32> to vector<1x3x1xf32>
    %cst_3 = arith.constant dense<0.000000e+00> : vector<1xf32>
    %6 = vector.multi_reduction <add>, %5, %cst_3 [1, 2] : vector<1x3x1xf32> to vector<1xf32>
    %7 = vector.shape_cast %6 : vector<1xf32> to vector<1x1x1xf32>
    %8 = vector.extract %7[0, 0, 0] : f32 from vector<1x1x1xf32>
    %c0_4 = arith.constant 0 : index
    %9 = memref.load %arg0[%c0_4] : memref<1xf32, #tpu.memory_space<smem>>
    %10 = vector.broadcast %9 : f32 to vector<3x2048xf32>
    %11 = arith.mulf %10, %0 : vector<3x2048xf32>
    %cst_5 = arith.constant 1.000000e+00 : f32
    %12 = arith.subf %cst_5, %9 : f32
    %13 = arith.mulf %12, %8 : f32
    %14 = vector.broadcast %13 : f32 to vector<3x2048xf32>
    %15 = arith.addf %11, %14 : vector<3x2048xf32>
    %cst_6 = arith.constant 0.000000e+00 : f32
    %cst_7 = arith.constant 1.000000e+00 : f32
    %16 = vector.broadcast %cst_6 : f32 to vector<3x2048xf32>
    %17 = arith.maximumf %16, %15 : vector<3x2048xf32>
    %18 = vector.broadcast %cst_7 : f32 to vector<3x2048xf32>
    %19 = arith.minimumf %18, %17 : vector<3x2048xf32>
    %c0_8 = arith.constant 0 : index
    %c0_9 = arith.constant 0 : index
    %20 = vector.load %arg3[%c0_8, %c0_9] : memref<3x2048xf32, #tpu.memory_space<vmem>>, vector<3x2048xf32>
    tpu.vector_store %arg3[%c0_8, %c0_9], %19 {strides = array<i32>} : memref<3x2048xf32, #tpu.memory_space<vmem>>, vector<3x2048xf32>,
    return
  }
}

</mosaic_0001>

<bundles_post_ra>
// kernel: tpu_custom_call.1
= control target key start
LH: loop header
LB: loop body
LE: loop exit
PB: predicated region body
PF: predicated region fallthrough
CT: control target
= control target key end

     0   :  { %9 = vsyncpa [#allocation4], 0  ;;  %s316_s0 = inlined_call_operand.<no memory space> [shape: f32[1], index: 0, kind: input, shape index: {}]   ;;  %s317_s1 = inlined_call_operand.vmem [shape: f32[3,1], index: 1, kind: input, shape index: {}]   ;;  %s318_s2 = inlined_call_operand.hbm [shape: f32[3,2048], index: 2, kind: input, shape index: {}]   ;;  %s319_s3 = inlined_call_operand.hbm [shape: f32[3,2048], index: 3, kind: output, shape index: {}]  }
   0x1   :  { %10 = vsyncpa [#allocation5], 0  ;;  %s227_s12 = smov [#allocation3]   ;;  %s179_s16 = scalar_lea.hbm %s318_s2, 1024 }
   0x2   :  { %s21_s13 = sshll.u32 %s227_s12, 4  ;;  %p180_p0 = scmp.ne.s32.totalorder %s318_s2, %s179_s16  ;;  %s22_s13 = int_to_ptr.vmem [resolvable:$true] %s21_s13 }
   0x3   :  { %p183_p1 = scmp.lt.u32.totalorder %s179_s16, %s318_s2 }
   0x5   :  { %p185_p2 = pnand %p183_p1, %p180_p0 }
   0x7   :  { %188 = shalt.err (!%p185_p2)
}
   0x8   :  { %s189_s21 = scalar_lea.vmem %s22_s13, 1024  ;;  %p194_p4 = scmp.lt.s32.totalorder %s22_s13, %s22_s13 }
   0x9   :  { %p190_p3 = scmp.ne.s32.totalorder %s22_s13, %s189_s21  ;;  %p195_p5 = scmp.lt.s32.totalorder %s189_s21, %s189_s21 }
   0xb   :  { %p196_p6 = por %p195_p5, %p194_p4 }
   0xd   :  { %p197_p7 = pnand %p196_p6, %p190_p3 }
   0xf   :  { %200 = shalt.err (!%p197_p7)
}
  0x10   :  { %24 = dma.hbm_to_vmem [thread:$0]  %s318_s2, 1024, %s22_s13, [#allocation4]  }
  0x11   :  { %223 = dma.done.wait [#allocation4], 1024  }
  0x12   :  { %224 = vsyncadd [#allocation4], 4294966272  ;;  %vm60_vm0 = vcmask 1042432   ;;  %v261_v0 = vld [vmem:[#allocation3] sm:$0x77]  ;;  %vm96_vm1 = vcmask 2048   ;;  %v108_v58 = vstv %s316_s0 }
  0x13   :  { %v263_v1 = vld [vmem:[#allocation3 + $0x8] sm:$0x77]  ;;  %v44_v2 = vcombine.high %v261_v0, %v261_v0  ;;  %v269_v4 = vld [vmem:[#allocation3 + $0x10] sm:$0x77]  ;;  %v61_v5 = vsel %vm60_vm0, %v261_v0, 0.0  ;;  %v109_v59 = vmul.f32 %v108_v58, %v261_v0 }
  0x14   :  { %v45_v3 = vcombine.high %v263_v1, %v263_v1  ;;  %v64_v7 = vsel %vm60_vm0, %v263_v1, 0.0  ;;  %v46_v9 = vcombine.high %v269_v4, %v269_v4  ;;  %v31_v11 = vld [vmem:[#allocation3 + $0x18] sm:$0x77]  ;;  %v68_v13 = vsel %vm60_vm0, %v269_v4, 0.0  ;;  %v32_v17 = vld [vmem:[#allocation3 + $0x20] sm:$0x77] }
  0x15   :  { %v62_v6 = vsel %vm60_vm0, %v44_v2, 0.0  ;;  %v47_v15 = vcombine.high %v31_v11, %v31_v11  ;;  %v72_v19 = vsel %vm60_vm0, %v31_v11, 0.0  ;;  %v48_v21 = vcombine.high %v32_v17, %v32_v17  ;;  %v33_v23 = vld [vmem:[#allocation3 + $0x28] sm:$0x77]  ;;  %v34_v29 = vld [vmem:[#allocation3 + $0x30] sm:$0x77] }
  0x16   :  { %v63_v8 = vadd.f32 %v62_v6, %v61_v5  ;;  %v66_v10 = vsel %vm60_vm0, %v45_v3, 0.0  ;;  %v70_v16 = vsel %vm60_vm0, %v46_v9, 0.0  ;;  %v76_v25 = vsel %vm60_vm0, %v32_v17, 0.0  ;;  %v35_v35 = vld [vmem:[#allocation3 + $0x38] sm:$0x77] }
  0x17   :  { %v74_v22 = vsel %vm60_vm0, %v47_v15, 0.0  ;;  %v49_v27 = vcombine.high %v33_v23, %v33_v23  ;;  %v78_v28 = vsel %vm60_vm0, %v48_v21, 0.0  ;;  %v80_v31 = vsel %vm60_vm0, %v33_v23, 0.0  ;;  %v94_v47 = vld [vmem:[%s317_s1] sm:$0x7]  ;;  %s117_s1 = ssub.f32 1.0, %s316_s0 }
  0x18   :  { %v65_v12 = vadd.f32 %v64_v7, %v63_v8  ;;  %v50_v33 = vcombine.high %v34_v29, %v34_v29  ;;  %v84_v37 = vsel %vm60_vm0, %v34_v29, 0.0  ;;  %v51_v39 = vcombine.high %v35_v35, %v35_v35  ;;  %s228_s0 = smov [#allocation6]  }
  0x19   :  { %v82_v34 = vsel %vm60_vm0, %v49_v27, 0.0  ;;  %v88_v42 = vsel %vm60_vm0, %v35_v35, 0.0  ;;  %v110_v60 = vmul.f32 %v108_v58, %v263_v1  ;;  %v111_v61 = vmul.f32 %v108_v58, %v269_v4  ;;  %s158_s4 = sshll.u32 %s228_s0, 4  ;;  %s159_s4 = int_to_ptr.vmem [resolvable:$true] %s158_s4 }
  0x1a   :  { %v67_v14 = vadd.f32 %v66_v10, %v65_v12  ;;  %v86_v40 = vsel %vm60_vm0, %v50_v33, 0.0  ;;  %v90_v44 = vsel %vm60_vm0, %v51_v39, 0.0  ;;  %v112_v62 = vmul.f32 %v108_v58, %v31_v11  ;;  %s201_s5 = scalar_lea.vmem %s159_s4, 1024  ;;  %p206_p9 = scmp.lt.s32.totalorder %s159_s4, %s159_s4 }
  0x1b   :  { %v114_v63 = vmul.f32 %v108_v58, %v33_v23  ;;  %v115_v2 = vmul.f32 %v108_v58, %v34_v29  ;;  %v116_v3 = vmul.f32 %v108_v58, %v35_v35  ;;  %v113_v5 = vmul.f32 %v108_v58, %v32_v17  ;;  %p202_p8 = scmp.ne.s32.totalorder %s159_s4, %s201_s5  ;;  %p207_p10 = scmp.lt.s32.totalorder %s201_s5, %s201_s5 }
  0x1c   :  { %v69_v18 = vadd.f32 %v68_v13, %v67_v14 }
  0x1d   :  { %p208_p11 = por %p207_p10, %p206_p9 }
  0x1e   :  { %v71_v20 = vadd.f32 %v70_v16, %v69_v18 }
  0x1f   :  { %p209_p12 = pnand %p208_p11, %p202_p8 }
  0x20   :  { %v73_v24 = vadd.f32 %v72_v19, %v71_v20 }
  0x22   :  { %v75_v26 = vadd.f32 %v74_v22, %v73_v24 }
  0x24   :  { %v77_v30 = vadd.f32 %v76_v25, %v75_v26 }
  0x26   :  { %v79_v32 = vadd.f32 %v78_v28, %v77_v30 }
  0x28   :  { %v81_v36 = vadd.f32 %v80_v31, %v79_v32 }
  0x2a   :  { %v83_v38 = vadd.f32 %v82_v34, %v81_v36 }
  0x2c   :  { %v85_v41 = vadd.f32 %v84_v37, %v83_v38 }
  0x2e   :  { %v87_v43 = vadd.f32 %v86_v40, %v85_v41 }
  0x30   :  { %v89_v45 = vadd.f32 %v88_v42, %v87_v43 }
  0x32   :  { %v91_v46 = vadd.f32 %v90_v44, %v89_v45 }
  0x34   :  { %92 = vadd.xlane.f32.xlu0 %v91_v46 }
  0xc1   :  { %v93_v48 = vpop.xlane.xlu0 %92 }
  0xc2   :  { %v95_v49 = vmul.f32 %v94_v47, %v93_v48 }
  0xc4   :  { %v97_v50 = vsel %vm96_vm1, %v95_v49, 0.0 }
  0xc5   :  { %98 = vadd.xlane.f32.xlu0 %v97_v50 }
 0x152   :  { %v99_v51 = vpop.xlane.xlu0 %98 }
 0x153   :  { %v100_v52 = vrot.slane %v99_v51, 4 }
 0x155   :  { %v101_v53 = vadd.f32 %v100_v52, %v99_v51 }
 0x157   :  { %v102_v54 = vrot.slane %v101_v53, 2 }
 0x159   :  { %v103_v55 = vadd.f32 %v102_v54, %v101_v53 }
 0x15b   :  { %v104_v56 = vrot.slane %v103_v55, 1 }
 0x15d   :  { %v105_v57 = vadd.f32 %v104_v56, %v103_v55 }
 0x15f   :  { %167 = vpush %v105_v57 }
 0x190   :  { %s168_s29 = spop %167 }
 0x191   :  { %s118_s30 = smul.f32 %s168_s29, %s117_s1 }
 0x193   :  { %v119_v6 = vstv %s118_s30 }
 0x194   :  { %v120_v7 = vadd.f32 %v119_v6, %v109_v59  ;;  %v121_v8 = vadd.f32 %v119_v6, %v110_v60  ;;  %v122_v9 = vadd.f32 %v119_v6, %v111_v61  ;;  %v123_v10 = vadd.f32 %v119_v6, %v112_v62 }
 0x195   :  { %v124_v12 = vadd.f32 %v119_v6, %v113_v5  ;;  %v125_v13 = vadd.f32 %v119_v6, %v114_v63  ;;  %v126_v14 = vadd.f32 %v119_v6, %v115_v2  ;;  %v127_v15 = vadd.f32 %v119_v6, %v116_v3 }
 0x196   :  { %v128_v0 = vmax.f32 %v120_v7, 0.0  ;;  %v129_v16 = vmax.f32 %v121_v8, 0.0  ;;  %v130_v1 = vmax.f32 %v122_v9, 0.0  ;;  %v131_v18 = vmax.f32 %v123_v10, 0.0 }
 0x197   :  { %v132_v4 = vmax.f32 %v124_v12, 0.0  ;;  %v133_v11 = vmax.f32 %v125_v13, 0.0  ;;  %v134_v19 = vmax.f32 %v126_v14, 0.0  ;;  %v135_v17 = vmax.f32 %v127_v15, 0.0 }
 0x198   :  { %v136_v20 = vmin.f32 %v128_v0, 1.0  ;;  %v137_v21 = vmin.f32 %v129_v16, 1.0  ;;  %v138_v22 = vmin.f32 %v130_v1, 1.0  ;;  %v139_v23 = vmin.f32 %v131_v18, 1.0 }
 0x199   :  { %v140_v24 = vmin.f32 %v132_v4, 1.0  ;;  %v141_v25 = vmin.f32 %v133_v11, 1.0  ;;  %v142_v26 = vmin.f32 %v134_v19, 1.0  ;;  %v143_v27 = vmin.f32 %v135_v17, 1.0 }
 0x19a   :  { %144 = vst [vmem:[#allocation6] sm:$0x77] %v136_v20  ;;  %145 = vst [vmem:[#allocation6 + $0x8] sm:$0x77] %v137_v21 }
 0x19b   :  { %146 = vst [vmem:[#allocation6 + $0x10] sm:$0x77] %v138_v22  ;;  %147 = vst [vmem:[#allocation6 + $0x18] sm:$0x77] %v139_v23 }
 0x19c   :  { %148 = vst [vmem:[#allocation6 + $0x20] sm:$0x77] %v140_v24  ;;  %149 = vst [vmem:[#allocation6 + $0x28] sm:$0x77] %v141_v25 }
 0x19d   :  { %150 = vst [vmem:[#allocation6 + $0x30] sm:$0x77] %v142_v26  ;;  %151 = vst [vmem:[#allocation6 + $0x38] sm:$0x77] %v143_v27 }
 0x19e   :  { %212 = shalt.err (!%p209_p12)
}
 0x19f   :  { %s213_s8 = scalar_lea.hbm %s319_s3, 1024 }
 0x1a0   :  { %p214_p13 = scmp.ne.s32.totalorder %s319_s3, %s213_s8  ;;  %p217_p0 = scmp.lt.u32.totalorder %s213_s8, %s319_s3 }
 0x1a2   :  { %p219_p1 = pnand %p217_p0, %p214_p13 }
 0x1a4   :  { %222 = shalt.err (!%p219_p1)
}
 0x1a5   :  { %161 = dma.vmem_to_hbm [thread:$0]  %s159_s4, 1024, %s319_s3, [#allocation5]  }
 0x1a6   :  { %225 = dma.done.wait [#allocation5], 1024  }
 0x1a7   :  { %226 = vsyncadd [#allocation5], 4294966272 }
 0x1a8   :  { %165 = vsyncpa [#allocation4], 1 }
 0x1a9   :  { %166 = vsyncpa [#allocation5], 1 }

</bundles_post_ra>
